<compile_context>
chip_gen: v7x
topology: tpu7x:2x2x1
jax: 0.10.0
libtpu: 0.0.40
codegen_flags: <defaults>
</compile_context>

<pallas_src>
import functools

import jax
import jax.numpy as jnp
from jax import lax
from jax.experimental import pallas as pl
from jax.experimental.pallas import tpu as pltpu


def _round_up(x, m):
    return (x + m - 1) // m * m


def _cdiv(a, b):
    return -(-a // b)


def _bengali_ce_kernel(pred_ref, lab_ref, wlane_ref, out_ref, acc_ref, *,
                       batch, block_rows, steps_per_split,
                       offs, scaled_weights, upcast_logits):
    """One batch tile.

    pred_ref : (TB, C) float (VMEM)   -- logits, native dtype
    lab_ref  : (TB, 3) int32 (VMEM)   -- labels pre-shifted by head offsets
    wlane_ref: (1, C) float32 (VMEM)  -- per-lane head weight (w_h / batch)
    out_ref  : (8, 128) float32 (VMEM)-- per-split partial (lane-dense block)
    acc_ref  : (1, 1) float32 VMEM    -- running weighted loss sum
    """
    split = pl.program_id(0)
    step = pl.program_id(1)

    @pl.when(step == 0)
    def _init():
        acc_ref[...] = jnp.zeros_like(acc_ref)

    x = pred_ref[...]                       # (TB, C)
    if upcast_logits and x.dtype != jnp.float32:
        x = x.astype(jnp.float32)           # single upcast (v5e bf16 path)
    labels = lab_ref[...]                   # (TB, 3) int32
    w_lane = wlane_ref[...]                 # (1, C) f32

    tb, c_total = x.shape
    neg_fill = jnp.asarray(-jnp.inf, dtype=x.dtype)
    off1, off2 = offs                       # head boundaries (static)

    # Single lane iota (also needed for the one-hot picks); cheap mask algebra.
    lane = lax.broadcasted_iota(jnp.int32, (tb, c_total), 1)
    m0 = lane < off1                        # grapheme lanes
    m2 = lane >= off2                       # consonant lanes
    m02 = m0 | m2                           # complement == vowel lanes

    # Per-head max (XLU reductions), then ONE full-width shifted exp in f32.
    max0 = jnp.max(jnp.where(m0, x, neg_fill), axis=-1, keepdims=True)
    max2 = jnp.max(jnp.where(m2, x, neg_fill), axis=-1, keepdims=True)
    max1 = jnp.max(jnp.where(m02, neg_fill, x), axis=-1, keepdims=True)
    m_full = jnp.where(m0, max0, jnp.where(m2, max2, max1))

    xs = (x - m_full).astype(jnp.float32)   # (TB, C) f32, shifted logits
    e = jnp.exp(xs)

    s0 = jnp.sum(jnp.where(m0, e, 0.0), axis=-1, keepdims=True)
    s2 = jnp.sum(jnp.where(m2, e, 0.0), axis=-1, keepdims=True)
    s1 = jnp.sum(jnp.where(m02, 0.0, e), axis=-1, keepdims=True)

    # Fused true-class term: xs at the true lane of head h equals t_h - m_h,
    # and w_lane there is exactly (w_h / batch).
    onehot_any = ((lane == labels[:, 0:1]) | (lane == labels[:, 1:2])
                  | (lane == labels[:, 2:3]))
    wt = jnp.sum(jnp.where(onehot_any, w_lane * xs, 0.0),
                 axis=-1, keepdims=True)

    w0, w1, w2 = scaled_weights             # already include 1/batch
    per_row = (jnp.float32(w0) * jnp.log(s0)
               + jnp.float32(w1) * jnp.log(s1)
               + jnp.float32(w2) * jnp.log(s2)
               - wt)                        # (TB, 1)

    # Discard rows past the true batch (partial last block / split overrun).
    # Select (not multiply) so stale-VMEM NaN/inf in dead rows is harmless.
    row0 = (split * steps_per_split + step) * block_rows
    grow = row0 + lax.broadcasted_iota(jnp.int32, (tb, 1), 0)
    per_row = jnp.where(grow < batch, per_row, 0.0)

    acc_ref[...] += jnp.sum(per_row, axis=0, keepdims=True)

    @pl.when(step == steps_per_split - 1)
    def _finalize():
        # Single lane-dense write per split (unmasked vst); wrapper reads [0,0].
        out_ref[...] = jnp.broadcast_to(acc_ref[...], (8, 128))


def bengali_cross_entropy_loss(pred, true, *, n_grapheme, n_vowel, n_consonant,
                               weights=(1.0, 1.0, 1.0),
                               block_rows=4096, num_splits=1,
                               core_parallel=False, upcast_logits=False):
    """JAX wrapper around the Pallas kernel. Returns a scalar float32 loss.

    num_splits=2 + core_parallel=True shards the batch halves across the two
    TensorCores of a v7x chip; leave defaults on v5e/v6e (single TC).
    upcast_logits=True is recommended on v5e for bf16 inputs.

    NOTE: out-of-range labels silently contribute a huge loss instead of
    erroring like PyTorch; ignore_index is not supported.
    """
    batch, c_total = pred.shape
    assert c_total == n_grapheme + n_vowel + n_consonant
    assert true.shape == (batch, 3)

    # Layout plumbing: shift labels so the class index is a global lane index.
    offsets = jnp.asarray([0, n_grapheme, n_grapheme + n_vowel], dtype=jnp.int32)
    labels = true.astype(jnp.int32) + offsets[None, :]

    # Per-lane head weights (include the 1/batch of the mean reduction).
    inv_b = 1.0 / float(batch)
    scaled_weights = tuple(float(w) * inv_b for w in weights)
    w_lane = jnp.concatenate(
        [jnp.full((1, n_grapheme), scaled_weights[0], jnp.float32),
         jnp.full((1, n_vowel), scaled_weights[1], jnp.float32),
         jnp.full((1, n_consonant), scaled_weights[2], jnp.float32)], axis=1)

    # Batch tiling: scale the tile with the problem (no host-side padding of
    # pred — the last block may overrun; the in-kernel row mask discards it).
    itemsize = jnp.dtype(pred.dtype).itemsize
    lanes = _round_up(c_total, 128)
    bytes_per_row = lanes * itemsize + 128 * 4          # pred row + label row
    vmem_budget = 8 * 1024 * 1024                        # per pipeline buffer
    max_rows = max(8, (vmem_budget // bytes_per_row) // 8 * 8)

    rows_per_split = _cdiv(batch, num_splits)
    tb = max(8, min(block_rows, _round_up(rows_per_split, 8), max_rows))
    steps_per_split = max(1, _cdiv(_cdiv(batch, tb), num_splits))

    kernel = functools.partial(
        _bengali_ce_kernel,
        batch=batch, block_rows=tb, steps_per_split=steps_per_split,
        offs=(n_grapheme, n_grapheme + n_vowel),
        scaled_weights=scaled_weights, upcast_logits=upcast_logits)

    split_sem = pltpu.CORE_PARALLEL if core_parallel else pltpu.PARALLEL
    cost = pl.CostEstimate(
        flops=20 * int(batch) * int(c_total),
        transcendentals=int(batch) * (int(c_total) + 3),
        bytes_accessed=(int(batch) * int(c_total) * int(itemsize)
                        + int(batch) * 3 * 4
                        + int(num_splits) * 8 * 128 * 4),
    )

    partials = pl.pallas_call(
        kernel,
        out_shape=jax.ShapeDtypeStruct((num_splits * 8, 128), jnp.float32),
        grid_spec=pltpu.PrefetchScalarGridSpec(
            num_scalar_prefetch=0,
            grid=(num_splits, steps_per_split),
            in_specs=[
                pl.BlockSpec((tb, c_total),
                             lambda s, i: (s * steps_per_split + i, 0)),
                pl.BlockSpec((tb, 3),
                             lambda s, i: (s * steps_per_split + i, 0)),
                pl.BlockSpec((1, c_total), lambda s, i: (0, 0)),
            ],
            out_specs=pl.BlockSpec((8, 128), lambda s, i: (s, 0)),
            scratch_shapes=[pltpu.VMEM((1, 1), jnp.float32)],
        ),
        compiler_params=pltpu.CompilerParams(
            dimension_semantics=(split_sem, pltpu.ARBITRARY)),
        cost_estimate=cost,
    )(pred, labels, w_lane)

    # Each split's partial is replicated within its (8,128) block; pick [0,0].
    per_split = partials.reshape(num_splits, 8, 128)[:, 0, 0]
    return jnp.sum(per_split)


def _reference(pred, true, n_grapheme, n_vowel, n_consonant, weights):
    """Pure-JAX reference for a sanity check."""
    def ce(logits, labels):
        logp = jax.nn.log_softmax(logits.astype(jnp.float32), axis=-1)
        nll = -jnp.take_along_axis(logp, labels[:, None].astype(jnp.int32), axis=-1)
        return jnp.mean(nll)

    h0, h1 = n_grapheme, n_grapheme + n_vowel
    return (weights[0] * ce(pred[:, :h0], true[:, 0])
            + weights[1] * ce(pred[:, h0:h1], true[:, 1])
            + weights[2] * ce(pred[:, h1:], true[:, 2]))


if __name__ == "__main__":
    # Small synthetic shapes consistent with the module's forward.
    # batch deliberately NOT a multiple of 8 to exercise the pad-free path.
    n_grapheme, n_vowel, n_consonant = 16, 8, 8
    weights = (1.0, 1.0, 1.0)
    batch = 10
    c_total = n_grapheme + n_vowel + n_consonant

    key = jax.random.PRNGKey(0)
    k_pred, kg, kv, kc = jax.random.split(key, 4)
    pred = jax.random.normal(k_pred, (batch, c_total), dtype=jnp.float32)
    true = jnp.stack(
        [
            jax.random.randint(kg, (batch,), 0, n_grapheme),
            jax.random.randint(kv, (batch,), 0, n_vowel),
            jax.random.randint(kc, (batch,), 0, n_consonant),
        ],
        axis=1,
    ).astype(jnp.int32)

    loss = bengali_cross_entropy_loss(
        pred, true,
        n_grapheme=n_grapheme, n_vowel=n_vowel, n_consonant=n_consonant,
        weights=weights,
    )
    loss = jax.block_until_ready(loss)

    ref = _reference(pred, true, n_grapheme, n_vowel, n_consonant, weights)
    assert jnp.allclose(loss, ref, rtol=1e-5, atol=1e-5), (loss, ref)

    print("KERNEL_OK")
</pallas_src>

<mosaic_0001>
module attributes {stable_mosaic.version = 11 : i64} {
  func.func @_bengali_ce_kernel(%arg0: i32, %arg1: i32, %arg2: memref<16x32xf32, #tpu.memory_space<vmem>>, %arg3: memref<16x3xi32, #tpu.memory_space<vmem>>, %arg4: memref<1x32xf32, #tpu.memory_space<vmem>>, %arg5: memref<8x128xf32, #tpu.memory_space<vmem>>, %arg6: memref<1x1xf32, #tpu.memory_space<vmem>>) attributes {dimension_semantics = [#tpu.dimension_semantics<parallel>, #tpu.dimension_semantics<arbitrary>], iteration_bounds = array<i64: 1, 1>, scalar_prefetch = 0 : i64, scratch_operands = 1 : i64, tpu.core_type = #tpu.core_type<tc>, window_params = [{transform_indices = @transform_0, window_bounds = array<i64: 16, 32>}, {transform_indices = @transform_1, window_bounds = array<i64: 16, 3>}, {pipeline_mode = #tpu.pipeline_mode<synchronous>, transform_indices = @transform_2, window_bounds = array<i64: 1, 32>}, {transform_indices = @transform_3, window_bounds = array<i64: 8, 128>}]} {
    %c0_i32 = arith.constant 0 : i32
    %0 = arith.cmpi eq, %arg1, %c0_i32 : i32
    %1 = arith.extui %0 : i1 to i32
    %c0_i32_0 = arith.constant 0 : i32
    %2 = arith.cmpi ne, %1, %c0_i32_0 : i32
    scf.if %2 {
      %cst_31 = arith.constant 0.000000e+00 : f32
      %93 = vector.broadcast %cst_31 : f32 to vector<1x1xf32>
      %c0_32 = arith.constant 0 : index
      %c0_33 = arith.constant 0 : index
      %94 = vector.load %arg6[%c0_32, %c0_33] : memref<1x1xf32, #tpu.memory_space<vmem>>, vector<1x1xf32>
      tpu.vector_store %arg6[%c0_32, %c0_33], %93 {strides = array<i32>} : memref<1x1xf32, #tpu.memory_space<vmem>>, vector<1x1xf32>,
    } else {
    }
    %c0 = arith.constant 0 : index
    %c0_1 = arith.constant 0 : index
    %3 = vector.load %arg2[%c0, %c0_1] : memref<16x32xf32, #tpu.memory_space<vmem>>, vector<16x32xf32>
    %c0_2 = arith.constant 0 : index
    %c0_3 = arith.constant 0 : index
    %4 = vector.load %arg3[%c0_2, %c0_3] : memref<16x3xi32, #tpu.memory_space<vmem>>, vector<16x3xi32>
    %c0_4 = arith.constant 0 : index
    %c0_5 = arith.constant 0 : index
    %5 = vector.load %arg4[%c0_4, %c0_5] : memref<1x32xf32, #tpu.memory_space<vmem>>, vector<1x32xf32>
    %6 = tpu.iota {dimensions = array<i32: 1>} : vector<16x32xi32>
    %c16_i32 = arith.constant 16 : i32
    %7 = vector.broadcast %c16_i32 : i32 to vector<16x32xi32>
    %8 = arith.cmpi slt, %6, %7 : vector<16x32xi32>
    %c24_i32 = arith.constant 24 : i32
    %9 = vector.broadcast %c24_i32 : i32 to vector<16x32xi32>
    %10 = arith.cmpi sge, %6, %9 : vector<16x32xi32>
    %11 = arith.ori %8, %10 : vector<16x32xi1>
    %cst = arith.constant 0xFF800000 : f32
    %12 = vector.broadcast %cst : f32 to vector<16x32xf32>
    %13 = arith.select %8, %3, %12 : vector<16x32xi1>, vector<16x32xf32>
    %cst_6 = arith.constant dense<0xFF800000> : vector<16xf32>
    %14 = vector.multi_reduction <maximumf>, %13, %cst_6 [1] : vector<16x32xf32> to vector<16xf32>
    %15 = vector.shape_cast %14 : vector<16xf32> to vector<16x1xf32>
    %cst_7 = arith.constant 0xFF800000 : f32
    %16 = vector.broadcast %cst_7 : f32 to vector<16x32xf32>
    %17 = arith.select %10, %3, %16 : vector<16x32xi1>, vector<16x32xf32>
    %cst_8 = arith.constant dense<0xFF800000> : vector<16xf32>
    %18 = vector.multi_reduction <maximumf>, %17, %cst_8 [1] : vector<16x32xf32> to vector<16xf32>
    %19 = vector.shape_cast %18 : vector<16xf32> to vector<16x1xf32>
    %cst_9 = arith.constant 0xFF800000 : f32
    %20 = vector.broadcast %cst_9 : f32 to vector<16x32xf32>
    %21 = arith.select %11, %20, %3 : vector<16x32xi1>, vector<16x32xf32>
    %cst_10 = arith.constant dense<0xFF800000> : vector<16xf32>
    %22 = vector.multi_reduction <maximumf>, %21, %cst_10 [1] : vector<16x32xf32> to vector<16xf32>
    %23 = vector.shape_cast %22 : vector<16xf32> to vector<16x1xf32>
    %24 = vector.shape_cast %19 : vector<16x1xf32> to vector<16x1xf32>
    %25 = vector.broadcast %24 : vector<16x1xf32> to vector<16x32xf32>
    %26 = vector.shape_cast %23 : vector<16x1xf32> to vector<16x1xf32>
    %27 = vector.broadcast %26 : vector<16x1xf32> to vector<16x32xf32>
    %28 = arith.select %10, %25, %27 : vector<16x32xi1>, vector<16x32xf32>
    %29 = vector.shape_cast %15 : vector<16x1xf32> to vector<16x1xf32>
    %30 = vector.broadcast %29 : vector<16x1xf32> to vector<16x32xf32>
    %31 = arith.select %8, %30, %28 : vector<16x32xi1>, vector<16x32xf32>
    %32 = arith.subf %3, %31 : vector<16x32xf32>
    %33 = math.exp %32 : vector<16x32xf32>
    %cst_11 = arith.constant 0.000000e+00 : f32
    %34 = vector.broadcast %cst_11 : f32 to vector<16x32xf32>
    %35 = arith.select %8, %33, %34 : vector<16x32xi1>, vector<16x32xf32>
    %cst_12 = arith.constant dense<0.000000e+00> : vector<16xf32>
    %36 = vector.multi_reduction <add>, %35, %cst_12 [1] : vector<16x32xf32> to vector<16xf32>
    %37 = vector.shape_cast %36 : vector<16xf32> to vector<16x1xf32>
    %cst_13 = arith.constant 0.000000e+00 : f32
    %38 = vector.broadcast %cst_13 : f32 to vector<16x32xf32>
    %39 = arith.select %10, %33, %38 : vector<16x32xi1>, vector<16x32xf32>
    %cst_14 = arith.constant dense<0.000000e+00> : vector<16xf32>
    %40 = vector.multi_reduction <add>, %39, %cst_14 [1] : vector<16x32xf32> to vector<16xf32>
    %41 = vector.shape_cast %40 : vector<16xf32> to vector<16x1xf32>
    %cst_15 = arith.constant 0.000000e+00 : f32
    %42 = vector.broadcast %cst_15 : f32 to vector<16x32xf32>
    %43 = arith.select %11, %42, %33 : vector<16x32xi1>, vector<16x32xf32>
    %cst_16 = arith.constant dense<0.000000e+00> : vector<16xf32>
    %44 = vector.multi_reduction <add>, %43, %cst_16 [1] : vector<16x32xf32> to vector<16xf32>
    %45 = vector.shape_cast %44 : vector<16xf32> to vector<16x1xf32>
    %46 = vector.extract_strided_slice %4 {offsets = [0, 0], sizes = [16, 1], strides = [1, 1]} : vector<16x3xi32> to vector<16x1xi32>
    %47 = vector.broadcast %46 : vector<16x1xi32> to vector<16x32xi32>
    %48 = arith.cmpi eq, %6, %47 : vector<16x32xi32>
    %49 = vector.extract_strided_slice %4 {offsets = [0, 1], sizes = [16, 1], strides = [1, 1]} : vector<16x3xi32> to vector<16x1xi32>
    %50 = vector.broadcast %49 : vector<16x1xi32> to vector<16x32xi32>
    %51 = arith.cmpi eq, %6, %50 : vector<16x32xi32>
    %52 = arith.ori %48, %51 : vector<16x32xi1>
    %53 = vector.extract_strided_slice %4 {offsets = [0, 2], sizes = [16, 1], strides = [1, 1]} : vector<16x3xi32> to vector<16x1xi32>
    %54 = vector.broadcast %53 : vector<16x1xi32> to vector<16x32xi32>
    %55 = arith.cmpi eq, %6, %54 : vector<16x32xi32>
    %56 = arith.ori %52, %55 : vector<16x32xi1>
    %57 = vector.broadcast %5 : vector<1x32xf32> to vector<16x32xf32>
    %58 = arith.mulf %57, %32 : vector<16x32xf32>
    %cst_17 = arith.constant 0.000000e+00 : f32
    %59 = vector.broadcast %cst_17 : f32 to vector<16x32xf32>
    %60 = arith.select %56, %58, %59 : vector<16x32xi1>, vector<16x32xf32>
    %cst_18 = arith.constant dense<0.000000e+00> : vector<16xf32>
    %61 = vector.multi_reduction <add>, %60, %cst_18 [1] : vector<16x32xf32> to vector<16xf32>
    %62 = vector.shape_cast %61 : vector<16xf32> to vector<16x1xf32>
    %63 = math.log %37 : vector<16x1xf32>
    %cst_19 = arith.constant 1.000000e-01 : f32
    %64 = vector.broadcast %cst_19 : f32 to vector<16x1xf32>
    %65 = arith.mulf %64, %63 : vector<16x1xf32>
    %66 = math.log %45 : vector<16x1xf32>
    %cst_20 = arith.constant 1.000000e-01 : f32
    %67 = vector.broadcast %cst_20 : f32 to vector<16x1xf32>
    %68 = arith.mulf %67, %66 : vector<16x1xf32>
    %69 = arith.addf %65, %68 : vector<16x1xf32>
    %70 = math.log %41 : vector<16x1xf32>
    %cst_21 = arith.constant 1.000000e-01 : f32
    %71 = vector.broadcast %cst_21 : f32 to vector<16x1xf32>
    %72 = arith.mulf %71, %70 : vector<16x1xf32>
    %73 = arith.addf %69, %72 : vector<16x1xf32>
    %74 = arith.subf %73, %62 : vector<16x1xf32>
    %c1_i32 = arith.constant 1 : i32
    %75 = arith.muli %arg0, %c1_i32 : i32
    %76 = arith.addi %75, %arg1 : i32
    %c16_i32_22 = arith.constant 16 : i32
    %77 = arith.muli %76, %c16_i32_22 : i32
    %78 = tpu.iota {dimensions = array<i32: 0>} : vector<16x1xi32>
    %79 = vector.broadcast %77 : i32 to vector<16x1xi32>
    %80 = arith.addi %79, %78 : vector<16x1xi32>
    %c10_i32 = arith.constant 10 : i32
    %81 = vector.broadcast %c10_i32 : i32 to vector<16x1xi32>
    %82 = arith.cmpi slt, %80, %81 : vector<16x1xi32>
    %cst_23 = arith.constant 0.000000e+00 : f32
    %83 = vector.broadcast %cst_23 : f32 to vector<16x1xf32>
    %84 = arith.select %82, %74, %83 : vector<16x1xi1>, vector<16x1xf32>
    %c0_24 = arith.constant 0 : index
    %c0_25 = arith.constant 0 : index
    %85 = vector.load %arg6[%c0_24, %c0_25] : memref<1x1xf32, #tpu.memory_space<vmem>>, vector<1x1xf32>
    %cst_26 = arith.constant dense<0.000000e+00> : vector<1xf32>
    %86 = vector.multi_reduction <add>, %84, %cst_26 [0] : vector<16x1xf32> to vector<1xf32>
    %87 = vector.shape_cast %86 : vector<1xf32> to vector<1x1xf32>
    %88 = arith.addf %85, %87 : vector<1x1xf32>
    %c0_27 = arith.constant 0 : index
    %c0_28 = arith.constant 0 : index
    %89 = vector.load %arg6[%c0_27, %c0_28] : memref<1x1xf32, #tpu.memory_space<vmem>>, vector<1x1xf32>
    tpu.vector_store %arg6[%c0_27, %c0_28], %88 {strides = array<i32>} : memref<1x1xf32, #tpu.memory_space<vmem>>, vector<1x1xf32>,
    %c0_i32_29 = arith.constant 0 : i32
    %90 = arith.cmpi eq, %arg1, %c0_i32_29 : i32
    %91 = arith.extui %90 : i1 to i32
    %c0_i32_30 = arith.constant 0 : i32
    %92 = arith.cmpi ne, %91, %c0_i32_30 : i32
    scf.if %92 {
      %c0_31 = arith.constant 0 : index
      %c0_32 = arith.constant 0 : index
      %93 = vector.load %arg6[%c0_31, %c0_32] : memref<1x1xf32, #tpu.memory_space<vmem>>, vector<1x1xf32>
      %94 = vector.shape_cast %93 : vector<1x1xf32> to vector<1x1xf32>
      %95 = vector.broadcast %94 : vector<1x1xf32> to vector<8x128xf32>
      %c0_33 = arith.constant 0 : index
      %c0_34 = arith.constant 0 : index
      %96 = vector.load %arg5[%c0_33, %c0_34] : memref<8x128xf32, #tpu.memory_space<vmem>>, vector<8x128xf32>
      tpu.vector_store %arg5[%c0_33, %c0_34], %95 {strides = array<i32>} : memref<8x128xf32, #tpu.memory_space<vmem>>, vector<8x128xf32>,
    } else {
    }
    return
  }
  func.func @transform_0(%arg0: i32, %arg1: i32) -> (i32, i32) {
    %c1_i32 = arith.constant 1 : i32
    %0 = arith.muli %arg0, %c1_i32 : i32
    %1 = arith.addi %0, %arg1 : i32
    %c0_i32 = arith.constant 0 : i32
    %c0_i32_0 = arith.constant 0 : i32
    return %1, %c0_i32 : i32, i32
  }
  func.func @transform_1(%arg0: i32, %arg1: i32) -> (i32, i32) {
    %c1_i32 = arith.constant 1 : i32
    %0 = arith.muli %arg0, %c1_i32 : i32
    %1 = arith.addi %0, %arg1 : i32
    %c0_i32 = arith.constant 0 : i32
    %c0_i32_0 = arith.constant 0 : i32
    return %1, %c0_i32 : i32, i32
  }
  func.func @transform_2(%arg0: i32, %arg1: i32) -> (i32, i32) {
    %c0_i32 = arith.constant 0 : i32
    %c0_i32_0 = arith.constant 0 : i32
    %c0_i32_1 = arith.constant 0 : i32
    return %c0_i32, %c0_i32_0 : i32, i32
  }
  func.func @transform_3(%arg0: i32, %arg1: i32) -> (i32, i32) {
    %c0_i32 = arith.constant 0 : i32
    %c0_i32_0 = arith.constant 0 : i32
    return %arg0, %c0_i32 : i32, i32
  }
}

</mosaic_0001>

<bundles_post_ra>
// kernel: tpu_custom_call.1
= control target key start
LH: loop header
LB: loop body
LE: loop exit
PB: predicated region body
PF: predicated region fallthrough
CT: control target
= control target key end

     0   :  { %v70_v0 = vlaneseq  ;;  %v317_v1 = vmov 1   ;;  %v318_v2 = vmov 0   ;;  %s437_s0 = inlined_call_operand.vmem [shape: f32[10,32], index: 0, kind: input, shape index: {}]   ;;  %s438_s1 = inlined_call_operand.vmem [shape: s32[10,3], index: 1, kind: input, shape index: {}]   ;;  %s439_s2 = inlined_call_operand.vmem [shape: f32[1,32], index: 2, kind: input, shape index: {}]   ;;  %s440_s3 = inlined_call_operand.hbm [shape: f32[8,128], index: 3, kind: output, shape index: {}]  }
   0x1   :  { %273 = vset.pattern.permute.xlu1 %v317_v1  ;;  %272 = vset.pattern.permute.xlu0 %v318_v2 }
   0x2   :  { %8 = vsyncpa [#allocation4], 0  ;;  %v66_v3 = vld [vmem:[%s437_s0 + $0x8] sm:$0xff]  ;;  %v346_v4 = vand.u32 127, %v70_v0  ;;  %v65_v5 = vld [vmem:[%s437_s0] sm:$0xff]  ;;  %vm77_vm0 = vcmask 261120  }
   0x3   :  { %v68_v19 = vld [vmem:[%s438_s1 + $0x8] sm:$0xff]  ;;  %v67_v20 = vld [vmem:[%s438_s1] sm:$0xff]  ;;  %v319_v21 = vmov 2   ;;  %vm63_vm14 = vcmask 0   ;;  %v320_v63 = vmov 0.0  }
   0x4   :  { %vm73_vm1 = vcmp.ge.s32.totalorder %v346_v4, 24  ;;  %vm72_vm2 = vcmp.lt.s32.totalorder %v346_v4, 16  ;;  %v265_v45 = vld [vmem:[%s439_s2] ss:$0 sm:$0xff]  ;;  %64 = vst.msk [vmem:[#allocation2] sm:$0x1] %vm63_vm14, %v320_v63 }
   0x5   :  { %v85_v6 = vsel %vm73_vm1, %v66_v3, -inf  ;;  %v76_v7 = vsel %vm72_vm2, %v66_v3, -inf  ;;  %vm361_vm3 = vmor %vm72_vm2, %vm73_vm1  ;;  %v84_v9 = vsel %vm73_vm1, %v65_v5, -inf  ;;  %v75_v16 = vsel %vm72_vm2, %v65_v5, -inf  ;;  %s321_s2 = smov [#allocation3]  }
   0x6   :  { %v89_v10 = vsel %vm77_vm0, %v85_v6, -inf  ;;  %v81_v11 = vsel %vm77_vm0, %v76_v7, -inf  ;;  %v93_v12 = vsel %vm361_vm3, -inf, %v66_v3  ;;  %v86_v14 = vsel %vm77_vm0, %v84_v9, -inf  ;;  %s245_s20 = sshll.u32 %s321_s2, 4  ;;  %s246_s20 = int_to_ptr.vmem [resolvable:$true] %s245_s20 }
   0x7   :  { %90 = vmax.xlane.f32.xlu0 %v89_v10  ;;  %82 = vmax.xlane.f32.xlu1 %v81_v11  ;;  %v97_v13 = vsel %vm77_vm0, %v93_v12, -inf  ;;  %v92_v15 = vsel %vm361_vm3, -inf, %v65_v5  ;;  %v78_v18 = vsel %vm77_vm0, %v75_v16, -inf  ;;  %s293_s21 = scalar_lea.vmem %s246_s20, 128  ;;  %p298_p1 = scmp.lt.s32.totalorder %s246_s20, %s246_s20 }
   0x8   :  { %v94_v17 = vsel %vm77_vm0, %v92_v15, -inf  ;;  %p294_p0 = scmp.ne.s32.totalorder %s246_s20, %s293_s21  ;;  %p299_p2 = scmp.lt.s32.totalorder %s293_s21, %s293_s21 }
   0xa   :  { %p300_p3 = por %p299_p2, %p298_p1 }
   0xb   :  { %98 = vmax.xlane.f32.xlu0 %v97_v13  ;;  %87 = vmax.xlane.f32.xlu1 %v86_v14 }
   0xc   :  { %p301_p4 = pnand %p300_p3, %p294_p0 }
   0xf   :  { %95 = vmax.xlane.f32.xlu0 %v94_v17  ;;  %79 = vmax.xlane.f32.xlu1 %v78_v18 }
  0x20   :  { %146 = vperm.xlu1 %273, %v68_v19  }
  0x24   :  { %274 = vset.pattern.permute.xlu1 %v318_v2 }
  0x25   :  { %135 = vperm.xlu1 %274, %v67_v20   ;;  %138 = vperm.xlu0 %272, %v68_v19  }
  0x29   :  { %275 = vset.pattern.permute.xlu1 %v317_v1 }
  0x2a   :  { %143 = vperm.xlu1 %275, %v67_v20  }
  0x2e   :  { %276 = vset.pattern.permute.xlu1 %v319_v21 }
  0x2f   :  { %156 = vperm.xlu1 %276, %v68_v19   ;;  %v205_v19 = vshrl.u32 %v70_v0, 7 }
  0x33   :  { %153 = vperm.xlu1 %276, %v67_v20  }
  0x94   :  { %v91_v22 = vpop.xlane.xlu0 %90  ;;  %v83_v23 = vpop.xlane.xlu1 %82 }
  0x98   :  { %v99_v24 = vpop.xlane.xlu0 %98  ;;  %v88_v25 = vpop.xlane.xlu1 %87 }
  0x99   :  { %v101_v26 = vsel %vm73_vm1, %v91_v22, %v99_v24 }
  0x9a   :  { %v103_v27 = vsel %vm72_vm2, %v83_v23, %v101_v26  ;;  %v206_v26 = vadd.s32 8, %v205_v19 }
  0x9b   :  { %v105_v28 = vsub.f32 %v66_v3, %v103_v27 }
  0x9c   :  { %v96_v29 = vpop.xlane.xlu0 %95  ;;  %v80_v30 = vpop.xlane.xlu1 %79  ;;  %vm211_vm15 = vcmp.lt.s32.totalorder %v206_v26, 10 }
  0x9d   :  { %v108_v31 = vmul.f32 1.442695, %v105_v28  ;;  %v100_v32 = vsel %vm73_vm1, %v88_v25, %v96_v29  ;;  %v169_v50 = vmul.f32 %v265_v45, %v105_v28 }
  0x9e   :  { %v102_v33 = vsel %vm72_vm2, %v80_v30, %v100_v32 }
  0x9f   :  { %277 = vpow2.f32 %v108_v31  ;;  %v104_v34 = vsub.f32 %v65_v5, %v102_v33 }
  0xa0   :  { %v147_v35 = vpop.permute.xlu1 %146 }
  0xa1   :  { %v106_v36 = vmul.f32 1.442695, %v104_v34  ;;  %vm149_vm4 = vcmp.eq.s32.totalorder %v346_v4, %v147_v35  ;;  %v168_v59 = vmul.f32 %v265_v45, %v104_v34 }
  0xa3   :  { %279 = vpow2.f32 %v106_v36 }
  0xa4   :  { %v136_v37 = vpop.permute.xlu1 %135  ;;  %v139_v38 = vpop.permute.xlu0 %138 }
  0xa5   :  { %vm141_vm5 = vcmp.eq.s32.totalorder %v346_v4, %v139_v38  ;;  %vm140_vm7 = vcmp.eq.s32.totalorder %v346_v4, %v136_v37 }
  0xa6   :  { %vm151_vm6 = vmor %vm141_vm5, %vm149_vm4 }
  0xa9   :  { %v278_v39 = vpop.eup %277  ;;  %v144_v40 = vpop.permute.xlu1 %143 }
  0xaa   :  { %v127_v41 = vsel %vm361_vm3, 0.0, %v278_v39  ;;  %v111_v42 = vsel %vm72_vm2, %v278_v39, 0.0  ;;  %v119_v46 = vsel %vm73_vm1, %v278_v39, 0.0  ;;  %vm148_vm8 = vcmp.eq.s32.totalorder %v346_v4, %v144_v40 }
  0xab   :  { %v131_v43 = vsel %vm77_vm0, %v127_v41, 0.0  ;;  %v115_v44 = vsel %vm77_vm0, %v111_v42, 0.0  ;;  %v123_v51 = vsel %vm77_vm0, %v119_v46, 0.0  ;;  %vm150_vm11 = vmor %vm140_vm7, %vm148_vm8  ;;  %v214_v41 = vld [vmem:[#allocation2] sm:$0x1] }
  0xac   :  { %132 = vadd.xlane.f32.xlu0 %v131_v43  ;;  %116 = vadd.xlane.f32.xlu1 %v115_v44 }
  0xad   :  { %v280_v47 = vpop.eup %279 }
  0xae   :  { %v157_v48 = vpop.permute.xlu1 %156  ;;  %v110_v49 = vsel %vm72_vm2, %v280_v47, 0.0  ;;  %v126_v53 = vsel %vm361_vm3, 0.0, %v280_v47  ;;  %v118_v58 = vsel %vm73_vm1, %v280_v47, 0.0 }
  0xaf   :  { %vm159_vm9 = vcmp.eq.s32.totalorder %v346_v4, %v157_v48  ;;  %v112_v52 = vsel %vm77_vm0, %v110_v49, 0.0  ;;  %v128_v57 = vsel %vm77_vm0, %v126_v53, 0.0  ;;  %v120_v60 = vsel %vm77_vm0, %v118_v58, 0.0 }
  0xb0   :  { %vm161_vm10 = vmor %vm151_vm6, %vm159_vm9  ;;  %124 = vadd.xlane.f32.xlu0 %v123_v51  ;;  %113 = vadd.xlane.f32.xlu1 %v112_v52 }
  0xb1   :  { %v171_v54 = vsel %vm161_vm10, %v169_v50, 0.0 }
  0xb2   :  { %v154_v55 = vpop.permute.xlu1 %153  ;;  %v175_v56 = vsel %vm77_vm0, %v171_v54, 0.0 }
  0xb3   :  { %vm158_vm12 = vcmp.eq.s32.totalorder %v346_v4, %v154_v55 }
  0xb4   :  { %129 = vadd.xlane.f32.xlu1 %v128_v57  ;;  %176 = vadd.xlane.f32.xlu0 %v175_v56  ;;  %vm160_vm13 = vmor %vm150_vm11, %vm158_vm12 }
  0xb5   :  { %v170_v61 = vsel %vm160_vm13, %v168_v59, 0.0 }
  0xb6   :  { %v172_v62 = vsel %vm77_vm0, %v170_v61, 0.0 }
  0xb8   :  { %121 = vadd.xlane.f32.xlu1 %v120_v60 }
  0xbc   :  { %173 = vadd.xlane.f32.xlu1 %v172_v62 }
 0x139   :  { %v133_v1 = vpop.xlane.xlu0 %132  ;;  %v117_v2 = vpop.xlane.xlu1 %116 }
 0x13a   :  { %281 = vlog2.f32 %v133_v1 }
 0x13b   :  { %283 = vlog2.f32 %v117_v2 }
 0x13d   :  { %v125_v3 = vpop.xlane.xlu0 %124  ;;  %v114_v4 = vpop.xlane.xlu1 %113 }
 0x13e   :  { %285 = vlog2.f32 %v125_v3 }
 0x13f   :  { %287 = vlog2.f32 %v114_v4 }
 0x141   :  { %v130_v5 = vpop.xlane.xlu1 %129  ;;  %v177_v28 = vpop.xlane.xlu0 %176 }
 0x142   :  { %289 = vlog2.f32 %v130_v5 }
 0x144   :  { %v282_v6 = vpop.eup %281 }
 0x145   :  { %v284_v7 = vpop.eup %283  ;;  %v122_v8 = vpop.xlane.xlu1 %121  ;;  %v187_v9 = vmul.f32 0.6931472, %v282_v6 }
 0x146   :  { %v181_v10 = vmul.f32 0.6931472, %v284_v7  ;;  %291 = vlog2.f32 %v122_v8 }
 0x147   :  { %v189_v14 = vmul.f32 0.1, %v187_v9 }
 0x148   :  { %v286_v11 = vpop.eup %285  ;;  %v183_v15 = vmul.f32 0.1, %v181_v10 }
 0x149   :  { %v195_v12 = vmul.f32 0.6931472, %v286_v11  ;;  %v288_v13 = vpop.eup %287  ;;  %v174_v33 = vpop.xlane.xlu1 %173 }
 0x14a   :  { %v179_v18 = vmul.f32 0.6931472, %v288_v13  ;;  %v191_v21 = vadd.f32 %v189_v14, %v183_v15 }
 0x14b   :  { %v197_v17 = vmul.f32 0.1, %v195_v12 }
 0x14c   :  { %v290_v16 = vpop.eup %289  ;;  %v182_v25 = vmul.f32 0.1, %v179_v18 }
 0x14d   :  { %v185_v20 = vmul.f32 0.6931472, %v290_v16  ;;  %v199_v24 = vadd.f32 %v197_v17, %v191_v21 }
 0x14f   :  { %v188_v22 = vmul.f32 0.1, %v185_v20  ;;  %v201_v31 = vsub.f32 %v199_v24, %v177_v28 }
 0x150   :  { %v292_v23 = vpop.eup %291 }
 0x151   :  { %v193_v27 = vmul.f32 0.6931472, %v292_v23  ;;  %v190_v30 = vadd.f32 %v188_v22, %v182_v25  ;;  %v213_v35 = vsel %vm211_vm15, %v201_v31, 0.0 }
 0x153   :  { %v196_v29 = vmul.f32 0.1, %v193_v27 }
 0x155   :  { %v198_v32 = vadd.f32 %v196_v29, %v190_v30 }
 0x157   :  { %v200_v34 = vsub.f32 %v198_v32, %v174_v33 }
 0x159   :  { %v215_v36 = vadd.f32 %v213_v35, %v200_v34 }
 0x15b   :  { %v216_v37 = vrot.slane %v215_v36, 4 }
 0x15d   :  { %v217_v0 = vadd.f32 %v216_v37, %v215_v36 }
 0x15f   :  { %v218_v38 = vrot.slane %v217_v0, 2 }
 0x161   :  { %v219_v39 = vadd.f32 %v218_v38, %v217_v0 }
 0x163   :  { %v220_v40 = vrot.slane %v219_v39, 1 }
 0x165   :  { %v221_v42 = vadd.f32 %v220_v40, %v219_v39 }
 0x167   :  { %v222_v43 = vadd.f32 %v221_v42, %v214_v41 }
 0x169   :  { %224 = vst.msk [vmem:[#allocation2] sm:$0x1] %vm63_vm14, %v222_v43 }
 0x170   :  { %v266_v44 = vld [vmem:[#allocation2] ss:$0 sm:$0xff] }
 0x171   :  { %235 = vperm.xlu0 %272, %v266_v44  }
 0x1f0   :  { %v236_v45 = vpop.permute.xlu0 %235 }
 0x1f1   :  { %238 = vst [vmem:[#allocation3] sm:$0xff] %v236_v45 }
 0x1f2   :  { %304 = shalt.err (!%p301_p4)
}
 0x1f3   :  { %s305_s24 = scalar_lea.hbm %s440_s3, 128 }
 0x1f4   :  { %p306_p5 = scmp.ne.s32.totalorder %s440_s3, %s305_s24  ;;  %p309_p6 = scmp.lt.u32.totalorder %s305_s24, %s440_s3 }
 0x1f6   :  { %p311_p7 = pnand %p309_p6, %p306_p5 }
 0x1f8   :  { %314 = shalt.err (!%p311_p7)
}
 0x1f9   :  { %248 = dma.vmem_to_hbm [thread:$0]  %s246_s20, 128, %s440_s3, [#allocation4]  }
 0x1fa   :  { %315 = dma.done.wait [#allocation4], 128  }
 0x1fb   :  { %316 = vsyncadd [#allocation4], 4294967168 }
 0x1fc   :  { %252 = vsyncpa [#allocation4], 1 }

</bundles_post_ra>
